<compile_context>
chip_gen: v7x
topology: tpu7x:2x2x1
jax: 0.10.0
libtpu: 0.0.40
codegen_flags: <defaults>
</compile_context>

<pallas_src>
import jax
import jax.numpy as jnp
from jax import lax
from jax.experimental import pallas as pl
from jax.experimental.pallas import tpu as pltpu


def _round_up(x, m):
    return ((x + m - 1) // m) * m


def decoder_rnn_kernel(x_ref, h0_ref, w1i_ref, bi_ref, wh_ref, bh_ref,
                       w2_ref, b2_ref, out_ref, hout_ref, gi_ref, hall_ref):
    """Fused DecoderRNN over a whole sequence (all refs fully VMEM-resident).

    Padded f32 shapes:
      x_ref    : (T*BP, InP)     flattened inputs, BP = batch padded to 8
      h0_ref   : (BP, HP)        initial hidden, HP = hidden padded to 128
      w1i_ref  : (InP, 3*HP)     fc1 folded into GRU input weights, gate-aligned
      bi_ref   : (1, 3*HP)
      wh_ref   : (HP, 3*HP)      GRU hidden-side weights, gate-aligned
      bh_ref   : (1, 3*HP)
      w2_ref   : (HP, InP)       fc2 weights (pad rows are zero)
      b2_ref   : (1, InP)
      out_ref  : (T*BP, InP)
      hout_ref : (BP, HP)
      gi_ref   : scratch (T*BP, 3*HP)  input-side gate pre-activations
      hall_ref : scratch (T*BP, HP)    per-step hidden states
    """
    TB, _ = x_ref.shape
    BP, HP = h0_ref.shape
    GP = wh_ref.shape[1]          # 3 * HP
    T = TB // BP

    # ---- Phase 1: input-side projection for ALL steps, one batched matmul.
    gi_ref[...] = (jnp.dot(x_ref[...], w1i_ref[...],
                           preferred_element_type=jnp.float32) + bi_ref[...])

    # Hoist the bias broadcast out of the recurrence (JAX does not CSE it).
    bh_b = jnp.broadcast_to(bh_ref[...], (BP, GP))

    # ---- Phase 2: sequential recurrence. Per step: one (BP,HP)x(HP,GP)
    # matmul plus full-vreg gate math; h is carried in registers (one vreg).
    def step(t, h):
        row = pl.multiple_of(t * BP, BP)                       # sublane-aligned
        gi_t = gi_ref[pl.ds(row, BP), :]                       # (BP, GP)
        gh = jnp.dot(h, wh_ref[...],
                     preferred_element_type=jnp.float32) + bh_b
        rz = jax.nn.sigmoid(gi_t + gh)                         # full-lane sigmoid
        r = rz[:, 0:HP]                                        # vreg-aligned picks
        z = rz[:, HP:2 * HP]
        # b_hn stays inside the r * (...) term (torch.nn.GRU semantics).
        n = jnp.tanh(gi_t[:, 2 * HP:3 * HP] + r * gh[:, 2 * HP:3 * HP])
        h_new = (1.0 - z) * n + z * h
        hall_ref[pl.ds(row, BP), :] = h_new
        return h_new

    unroll = True if T <= 8 else 8
    h_final = lax.fori_loop(0, T, step, h0_ref[...], unroll=unroll)
    hout_ref[...] = h_final

    # ---- Phase 3: fc2 for ALL steps in one batched matmul (dense stores).
    out_ref[...] = (jnp.dot(hall_ref[...], w2_ref[...],
                            preferred_element_type=jnp.float32) + b2_ref[...])


@jax.jit
def _pallas_gru_steps(x3, h0, fused):
    """Run T decoder steps in ONE pallas_call. x3: (T, B, In), h0: (B, H)."""
    T, B, In = x3.shape
    H = h0.shape[-1]
    HP, GP = fused["wh"].shape
    InP = fused["w2"].shape[1]
    BP = _round_up(max(B, 1), 8)

    # Pad batch -> 8 sublanes, features/hidden -> 128 lanes; flatten (T, BP).
    xp = jnp.zeros((T, BP, InP), jnp.float32).at[:, :B, :In].set(x3)
    x2d = xp.reshape(T * BP, InP)
    h0p = jnp.zeros((BP, HP), jnp.float32).at[:B, :H].set(h0)

    vmem = pl.BlockSpec(memory_space=pltpu.MemorySpace.VMEM)
    out2d, h_p = pl.pallas_call(
        decoder_rnn_kernel,
        out_shape=(jax.ShapeDtypeStruct((T * BP, InP), jnp.float32),
                   jax.ShapeDtypeStruct((BP, HP), jnp.float32)),
        in_specs=[vmem] * 8,
        out_specs=(vmem, vmem),
        scratch_shapes=[pltpu.VMEM((T * BP, GP), jnp.float32),
                        pltpu.VMEM((T * BP, HP), jnp.float32)],
    )(x2d, h0p, fused["w1i"], fused["bi"], fused["wh"], fused["bh"],
      fused["w2"], fused["b2"])

    out = out2d.reshape(T, BP, InP)[:, :B, :In]
    h_T = h_p[:B, :H]
    return out, h_T


def init_params(key, input_size, hidden_size):
    """PyTorch-style uniform(-1/sqrt(fan), 1/sqrt(fan)) init; weights stored
    pre-transposed ("math" orientation), GRU gate order (r, z, n),
    independent keys per tensor (like PyTorch)."""
    H, In = hidden_size, input_size
    ks = jax.random.split(key, 16)

    def uni(k, shape, fan):
        bound = 1.0 / jnp.sqrt(jnp.asarray(fan, jnp.float32))
        return jax.random.uniform(k, shape, jnp.float32, -bound, bound)

    return dict(
        # fc1: Linear(In -> H), stored transposed: (In, H)
        w1=uni(ks[0], (In, H), In), b1=uni(ks[1], (1, H), In),
        # GRU input-side weights / biases
        wir=uni(ks[2], (H, H), H), wiz=uni(ks[3], (H, H), H), win=uni(ks[4], (H, H), H),
        bir=uni(ks[5], (1, H), H), biz=uni(ks[6], (1, H), H), bin=uni(ks[7], (1, H), H),
        # GRU hidden-side weights / biases
        whr=uni(ks[8], (H, H), H), whz=uni(ks[9], (H, H), H), whn=uni(ks[10], (H, H), H),
        bhr=uni(ks[11], (1, H), H), bhz=uni(ks[12], (1, H), H), bhn=uni(ks[13], (1, H), H),
        # fc2: Linear(H -> In), stored transposed: (H, In)
        w2=uni(ks[14], (H, In), H), b2=uni(ks[15], (1, In), H),
    )


def prepare_fused_params(p, input_size, hidden_size):
    """Build padded, fused kernel operands:
       * fc1 folded into the input-side gate projection (exact: no activation),
       * each gate in its own 128-lane block (vreg-aligned gate slices),
       * hidden padded to 128 rows/lanes; all pad rows/cols are zero so padded
         lanes never pollute real results."""
    In, H = input_size, hidden_size
    HP = _round_up(H, 128)
    InP = _round_up(In, 128)
    GP = 3 * HP

    wi = (p["wir"], p["wiz"], p["win"])
    bi = (p["bir"], p["biz"], p["bin"])
    wh = (p["whr"], p["whz"], p["whn"])
    bh = (p["bhr"], p["bhz"], p["bhn"])

    w1i_f = jnp.zeros((InP, GP), jnp.float32)
    bi_f = jnp.zeros((1, GP), jnp.float32)
    wh_f = jnp.zeros((HP, GP), jnp.float32)
    bh_f = jnp.zeros((1, GP), jnp.float32)
    for g in range(3):
        c0 = g * HP
        w1i_f = w1i_f.at[:In, c0:c0 + H].set(p["w1"] @ wi[g])
        bi_f = bi_f.at[:, c0:c0 + H].set(p["b1"] @ wi[g] + bi[g])
        wh_f = wh_f.at[:H, c0:c0 + H].set(wh[g])
        bh_f = bh_f.at[:, c0:c0 + H].set(bh[g])
    w2_f = jnp.zeros((HP, InP), jnp.float32).at[:H, :In].set(p["w2"])
    b2_f = jnp.zeros((1, InP), jnp.float32).at[:, :In].set(p["b2"])
    return dict(w1i=w1i_f, bi=bi_f, wh=wh_f, bh=bh_f, w2=w2_f, b2=b2_f)


def decoder_rnn_forward(x, h, fused, d_dim, x_dim, y_dim, hidden_size):
    """Module-equivalent single-step forward (T=1).
    x: (B, d_dim, x_dim, y_dim) f32; h: (1, B, H) f32 -> (out, h_new)."""
    B = x.shape[0]
    In = d_dim * x_dim * y_dim
    x3 = x.reshape(B, In)[None]                 # (1, B, In), matches .view(B, -1)
    h0 = h.reshape(B, hidden_size)              # n_layers == 1
    out, h_T = _pallas_gru_steps(x3, h0, fused)
    return (out[0].reshape(B, d_dim, x_dim, y_dim),
            h_T.reshape(1, B, hidden_size))


def decoder_rnn_sequence(x_seq, h, fused, d_dim, x_dim, y_dim, hidden_size):
    """Run a whole T-step decoder sequence in a single pallas_call."""
    T, B = x_seq.shape[0], x_seq.shape[1]
    In = d_dim * x_dim * y_dim
    x3 = x_seq.reshape(T, B, In)
    h0 = h.reshape(B, hidden_size)
    out, h_T = _pallas_gru_steps(x3, h0, fused)
    return (out.reshape(T, B, d_dim, x_dim, y_dim),
            h_T.reshape(1, B, hidden_size))


def reference_forward(x, h, p, d_dim, x_dim, y_dim, hidden_size):
    """Pure-JAX reference of the PyTorch forward (per-gate math, unfused)."""
    B = x.shape[0]
    In = d_dim * x_dim * y_dim
    H = hidden_size
    xf = x.reshape(B, In)
    hh = h.reshape(B, H)
    a = xf @ p["w1"] + p["b1"]
    r = jax.nn.sigmoid(a @ p["wir"] + p["bir"] + hh @ p["whr"] + p["bhr"])
    z = jax.nn.sigmoid(a @ p["wiz"] + p["biz"] + hh @ p["whz"] + p["bhz"])
    n = jnp.tanh(a @ p["win"] + p["bin"] + r * (hh @ p["whn"] + p["bhn"]))
    h_new = (1.0 - z) * n + z * hh
    out = h_new @ p["w2"] + p["b2"]
    return out.reshape(B, d_dim, x_dim, y_dim), h_new.reshape(1, B, H)


if __name__ == "__main__":
    # Shapes implied by the module: batch_size, d_dim, x_dim, y_dim, hidden_size.
    batch_size, d_dim, x_dim, y_dim = 2, 4, 4, 8      # input_size = 128
    hidden_size = 32
    n_layers = 1
    seq_len = 8

    key = jax.random.PRNGKey(0)
    kx, ks, kp = jax.random.split(key, 3)
    x = jax.random.normal(kx, (batch_size, d_dim, x_dim, y_dim), jnp.float32)
    x_seq = jax.random.normal(ks, (seq_len, batch_size, d_dim, x_dim, y_dim), jnp.float32)
    h = jnp.zeros((n_layers, batch_size, hidden_size), jnp.float32)  # initHidden()

    params = init_params(kp, d_dim * x_dim * y_dim, hidden_size)
    fused = prepare_fused_params(params, d_dim * x_dim * y_dim, hidden_size)

    # --- single-step forward (exact module semantics, T=1) -------------------
    out, h_new = decoder_rnn_forward(x, h, fused, d_dim, x_dim, y_dim, hidden_size)
    out = jax.block_until_ready(out)
    h_new = jax.block_until_ready(h_new)

    out_ref, h_ref = reference_forward(x, h, params, d_dim, x_dim, y_dim, hidden_size)
    assert out.shape == (batch_size, d_dim, x_dim, y_dim)
    assert h_new.shape == (n_layers, batch_size, hidden_size)
    assert jnp.allclose(out, out_ref, atol=1e-4, rtol=1e-4)
    assert jnp.allclose(h_new, h_ref, atol=1e-4, rtol=1e-4)

    # --- multi-step sequence: all T steps in ONE pallas_call ------------------
    outs, h_T = decoder_rnn_sequence(x_seq, h, fused, d_dim, x_dim, y_dim, hidden_size)
    outs = jax.block_until_ready(outs)
    h_T = jax.block_until_ready(h_T)

    h_r = h
    outs_r = []
    for t in range(seq_len):
        o_r, h_r = reference_forward(x_seq[t], h_r, params, d_dim, x_dim, y_dim, hidden_size)
        outs_r.append(o_r)
    outs_r = jnp.stack(outs_r, axis=0)
    assert outs.shape == (seq_len, batch_size, d_dim, x_dim, y_dim)
    assert jnp.allclose(outs, outs_r, atol=1e-4, rtol=1e-4)
    assert jnp.allclose(h_T, h_r, atol=1e-4, rtol=1e-4)

    print("KERNEL_OK")
</pallas_src>

<mosaic_0001>
module attributes {stable_mosaic.version = 11 : i64} {
  func.func @decoder_rnn_kernel(%arg0: memref<8x128xf32, #tpu.memory_space<vmem>>, %arg1: memref<8x128xf32, #tpu.memory_space<vmem>>, %arg2: memref<128x384xf32, #tpu.memory_space<vmem>>, %arg3: memref<1x384xf32, #tpu.memory_space<vmem>>, %arg4: memref<128x384xf32, #tpu.memory_space<vmem>>, %arg5: memref<1x384xf32, #tpu.memory_space<vmem>>, %arg6: memref<128x128xf32, #tpu.memory_space<vmem>>, %arg7: memref<1x128xf32, #tpu.memory_space<vmem>>, %arg8: memref<8x128xf32, #tpu.memory_space<vmem>>, %arg9: memref<8x128xf32, #tpu.memory_space<vmem>>, %arg10: memref<8x384xf32, #tpu.memory_space<vmem>>, %arg11: memref<8x128xf32, #tpu.memory_space<vmem>>) attributes {dimension_semantics = [], scalar_prefetch = 0 : i64, scratch_operands = 2 : i64, tpu.core_type = #tpu.core_type<tc>} {
    %c0 = arith.constant 0 : index
    %c0_0 = arith.constant 0 : index
    %0 = vector.load %arg0[%c0, %c0_0] : memref<8x128xf32, #tpu.memory_space<vmem>>, vector<8x128xf32>
    %c0_1 = arith.constant 0 : index
    %c0_2 = arith.constant 0 : index
    %1 = vector.load %arg2[%c0_1, %c0_2] : memref<128x384xf32, #tpu.memory_space<vmem>>, vector<128x384xf32>
    %cst = arith.constant dense<0.000000e+00> : vector<8x384xf32>
    %2 = tpu.matmul %0, %1, %cst {dimension_numbers = #tpu.dot_dimension_numbers<[1], [0], [0], [1], [0, 0, 1, 1], [], []>} : vector<8x128xf32>, vector<128x384xf32>, vector<8x384xf32> -> vector<8x384xf32>
    %c0_3 = arith.constant 0 : index
    %c0_4 = arith.constant 0 : index
    %3 = vector.load %arg3[%c0_3, %c0_4] : memref<1x384xf32, #tpu.memory_space<vmem>>, vector<1x384xf32>
    %4 = vector.broadcast %3 : vector<1x384xf32> to vector<8x384xf32>
    %5 = arith.addf %2, %4 : vector<8x384xf32>
    %c0_5 = arith.constant 0 : index
    %c0_6 = arith.constant 0 : index
    %6 = vector.load %arg10[%c0_5, %c0_6] : memref<8x384xf32, #tpu.memory_space<vmem>>, vector<8x384xf32>
    tpu.vector_store %arg10[%c0_5, %c0_6], %5 {strides = array<i32>} : memref<8x384xf32, #tpu.memory_space<vmem>>, vector<8x384xf32>,
    %c0_7 = arith.constant 0 : index
    %c0_8 = arith.constant 0 : index
    %7 = vector.load %arg5[%c0_7, %c0_8] : memref<1x384xf32, #tpu.memory_space<vmem>>, vector<1x384xf32>
    %8 = vector.shape_cast %7 : vector<1x384xf32> to vector<1x384xf32>
    %9 = vector.broadcast %8 : vector<1x384xf32> to vector<8x384xf32>
    %c0_9 = arith.constant 0 : index
    %c0_10 = arith.constant 0 : index
    %10 = vector.load %arg1[%c0_9, %c0_10] : memref<8x128xf32, #tpu.memory_space<vmem>>, vector<8x128xf32>
    %c0_i32 = arith.constant 0 : i32
    %c8_i32 = arith.constant 8 : i32
    %11 = arith.muli %c0_i32, %c8_i32 : i32
    %12 = tpu.assume_multiple %11, 8 : i32
    %13 = arith.index_cast %12 : i32 to index
    %c0_11 = arith.constant 0 : index
    %14 = vector.load %arg10[%13, %c0_11] : memref<8x384xf32, #tpu.memory_space<vmem>>, vector<8x384xf32>
    %c0_12 = arith.constant 0 : index
    %c0_13 = arith.constant 0 : index
    %15 = vector.load %arg4[%c0_12, %c0_13] : memref<128x384xf32, #tpu.memory_space<vmem>>, vector<128x384xf32>
    %cst_14 = arith.constant dense<0.000000e+00> : vector<8x384xf32>
    %16 = tpu.matmul %10, %15, %cst_14 {dimension_numbers = #tpu.dot_dimension_numbers<[1], [0], [0], [1], [0, 0, 1, 1], [], []>} : vector<8x128xf32>, vector<128x384xf32>, vector<8x384xf32> -> vector<8x384xf32>
    %17 = arith.addf %16, %9 : vector<8x384xf32>
    %18 = arith.addf %14, %17 : vector<8x384xf32>
    %19 = arith.negf %18 : vector<8x384xf32>
    %20 = math.exp %19 : vector<8x384xf32>
    %cst_15 = arith.constant 1.000000e+00 : f32
    %21 = vector.broadcast %cst_15 : f32 to vector<8x384xf32>
    %22 = arith.addf %21, %20 : vector<8x384xf32>
    %23 = arith.divf %21, %22 : vector<8x384xf32>
    %24 = vector.extract_strided_slice %23 {offsets = [0, 0], sizes = [8, 128], strides = [1, 1]} : vector<8x384xf32> to vector<8x128xf32>
    %25 = vector.extract_strided_slice %23 {offsets = [0, 128], sizes = [8, 128], strides = [1, 1]} : vector<8x384xf32> to vector<8x128xf32>
    %26 = vector.extract_strided_slice %14 {offsets = [0, 256], sizes = [8, 128], strides = [1, 1]} : vector<8x384xf32> to vector<8x128xf32>
    %27 = vector.extract_strided_slice %17 {offsets = [0, 256], sizes = [8, 128], strides = [1, 1]} : vector<8x384xf32> to vector<8x128xf32>
    %28 = arith.mulf %24, %27 : vector<8x128xf32>
    %29 = arith.addf %26, %28 : vector<8x128xf32>
    %30 = math.tanh %29 : vector<8x128xf32>
    %cst_16 = arith.constant 1.000000e+00 : f32
    %31 = vector.broadcast %cst_16 : f32 to vector<8x128xf32>
    %32 = arith.subf %31, %25 : vector<8x128xf32>
    %33 = arith.mulf %32, %30 : vector<8x128xf32>
    %34 = arith.mulf %25, %10 : vector<8x128xf32>
    %35 = arith.addf %33, %34 : vector<8x128xf32>
    %36 = arith.index_cast %12 : i32 to index
    %c0_17 = arith.constant 0 : index
    %37 = vector.load %arg11[%36, %c0_17] : memref<8x128xf32, #tpu.memory_space<vmem>>, vector<8x128xf32>
    tpu.vector_store %arg11[%36, %c0_17], %35 {strides = array<i32>} : memref<8x128xf32, #tpu.memory_space<vmem>>, vector<8x128xf32>,
    %c1_i32 = arith.constant 1 : i32
    %c0_18 = arith.constant 0 : index
    %c0_19 = arith.constant 0 : index
    %38 = vector.load %arg9[%c0_18, %c0_19] : memref<8x128xf32, #tpu.memory_space<vmem>>, vector<8x128xf32>
    tpu.vector_store %arg9[%c0_18, %c0_19], %35 {strides = array<i32>} : memref<8x128xf32, #tpu.memory_space<vmem>>, vector<8x128xf32>,
    %c0_20 = arith.constant 0 : index
    %c0_21 = arith.constant 0 : index
    %39 = vector.load %arg11[%c0_20, %c0_21] : memref<8x128xf32, #tpu.memory_space<vmem>>, vector<8x128xf32>
    %c0_22 = arith.constant 0 : index
    %c0_23 = arith.constant 0 : index
    %40 = vector.load %arg6[%c0_22, %c0_23] : memref<128x128xf32, #tpu.memory_space<vmem>>, vector<128x128xf32>
    %cst_24 = arith.constant dense<0.000000e+00> : vector<8x128xf32>
    %41 = tpu.matmul %39, %40, %cst_24 {dimension_numbers = #tpu.dot_dimension_numbers<[1], [0], [0], [1], [0, 0, 1, 1], [], []>} : vector<8x128xf32>, vector<128x128xf32>, vector<8x128xf32> -> vector<8x128xf32>
    %c0_25 = arith.constant 0 : index
    %c0_26 = arith.constant 0 : index
    %42 = vector.load %arg7[%c0_25, %c0_26] : memref<1x128xf32, #tpu.memory_space<vmem>>, vector<1x128xf32>
    %43 = vector.broadcast %42 : vector<1x128xf32> to vector<8x128xf32>
    %44 = arith.addf %41, %43 : vector<8x128xf32>
    %c0_27 = arith.constant 0 : index
    %c0_28 = arith.constant 0 : index
    %45 = vector.load %arg8[%c0_27, %c0_28] : memref<8x128xf32, #tpu.memory_space<vmem>>, vector<8x128xf32>
    tpu.vector_store %arg8[%c0_27, %c0_28], %44 {strides = array<i32>} : memref<8x128xf32, #tpu.memory_space<vmem>>, vector<8x128xf32>,
    return
  }
}

</mosaic_0001>

<bundles_post_ra>
// kernel: _pallas_gru_steps.1
= control target key start
LH: loop header
LB: loop body
LE: loop exit
PB: predicated region body
PF: predicated region fallthrough
CT: control target
= control target key end

     0   :  { %15 = vsyncpa [#allocation5], 0  ;;  %s1175_s0 = inlined_call_operand.vmem [shape: f32[8,128], index: 0, kind: input, shape index: {}]   ;;  %s1176_s1 = inlined_call_operand.vmem [shape: f32[8,128], index: 1, kind: input, shape index: {}]   ;;  %s1177_s2 = inlined_call_operand.hbm [shape: f32[128,384], index: 2, kind: input, shape index: {}]   ;;  %s1178_s3 = inlined_call_operand.vmem [shape: f32[1,384], index: 3, kind: input, shape index: {}]   ;;  %s1179_s4 = inlined_call_operand.hbm [shape: f32[128,384], index: 4, kind: input, shape index: {}]   ;;  %s1180_s5 = inlined_call_operand.vmem [shape: f32[1,384], index: 5, kind: input, shape index: {}]   ;;  %s1181_s6 = inlined_call_operand.hbm [shape: f32[128,128], index: 6, kind: input, shape index: {}]   ;;  %s1182_s7 = inlined_call_operand.vmem [shape: f32[1,128], index: 7, kind: input, shape index: {}]   ;;  %s1183_s8 = inlined_call_operand.vmem [shape: f32[8,128], index: 8, kind: output, shape index: {0}]   ;;  %s1184_s9 = inlined_call_operand.vmem [shape: f32[8,128], index: 9, kind: output, shape index: {1}]  }
   0x1   :  { %16 = vsyncpa [#allocation7], 0  ;;  %s1014_s30 = smov [#allocation6]   ;;  %s1015_s11 = smov [#allocation4]  }
   0x2   :  { %s40_s10 = sshll.u32 %s1014_s30, 4  ;;  %s26_s12 = sshll.u32 %s1015_s11, 4  ;;  %s41_s10 = int_to_ptr.vmem [resolvable:$true] %s40_s10  ;;  %s1074_s12 = int_to_ptr.vmem [resolvable:$true] %s26_s12 }
   0x3   :  { %s944_s15 = scalar_lea.hbm %s1179_s4, 6144 }
   0x4   :  { %p945_p0 = scmp.ne.s32.totalorder %s1179_s4, %s944_s15  ;;  %p948_p1 = scmp.lt.u32.totalorder %s944_s15, %s1179_s4 }
   0x6   :  { %p950_p2 = pnand %p948_p1, %p945_p0 }
   0x8   :  { %953 = shalt.err (!%p950_p2)
}
   0x9   :  { %s954_s20 = scalar_lea.vmem %s41_s10, 6144  ;;  %p959_p4 = scmp.lt.s32.totalorder %s41_s10, %s41_s10 }
   0xa   :  { %p955_p3 = scmp.ne.s32.totalorder %s41_s10, %s954_s20  ;;  %p960_p5 = scmp.lt.s32.totalorder %s954_s20, %s954_s20 }
   0xc   :  { %p961_p6 = por %p960_p5, %p959_p4 }
   0xe   :  { %p962_p7 = pnand %p961_p6, %p955_p3 }
  0x10   :  { %965 = shalt.err (!%p962_p7)
}
  0x11   :  { %s1016_s21 = smov 384   ;;  %s1017_s22 = smov 24  }
  0x12   :  { %46 = dma.hbm_to_vmem [thread:$0]  %s1179_s4, 6144, %s41_s10, [#allocation7], %s1016_s21, %s1016_s21, %s1017_s22  }
  0x13   :  { %s966_s27 = scalar_lea.hbm %s1177_s2, 6144 }
  0x14   :  { %p967_p8 = scmp.ne.s32.totalorder %s1177_s2, %s966_s27  ;;  %p970_p9 = scmp.lt.u32.totalorder %s966_s27, %s1177_s2 }
  0x16   :  { %p972_p10 = pnand %p970_p9, %p967_p8 }
  0x18   :  { %975 = shalt.err (!%p972_p10)
}
  0x19   :  { %s976_s13 = scalar_lea.vmem %s1074_s12, 6144  ;;  %p981_p12 = scmp.lt.s32.totalorder %s1074_s12, %s1074_s12 }
  0x1a   :  { %p977_p11 = scmp.ne.s32.totalorder %s1074_s12, %s976_s13  ;;  %p982_p13 = scmp.lt.s32.totalorder %s976_s13, %s976_s13 }
  0x1c   :  { %p983_p0 = por %p982_p13, %p981_p12 }
  0x1e   :  { %p984_p1 = pnand %p983_p0, %p977_p11 }
  0x20   :  { %987 = shalt.err (!%p984_p1)
}
  0x21   :  { %32 = dma.hbm_to_vmem [thread:$0]  %s1177_s2, 6144, %s1074_s12, [#allocation5], %s1016_s21, %s1016_s21, %s1017_s22  }
  0x22   :  { %s1018_s14 = smov [#allocation8]   ;;  %s988_s18 = scalar_lea.hbm %s1181_s6, 2048 }
  0x23   :  { %s54_s15 = sshll.u32 %s1018_s14, 4  ;;  %p989_p2 = scmp.ne.s32.totalorder %s1181_s6, %s988_s18  ;;  %s55_s15 = int_to_ptr.vmem [resolvable:$true] %s54_s15 }
  0x24   :  { %p992_p3 = scmp.lt.u32.totalorder %s988_s18, %s1181_s6 }
  0x26   :  { %p994_p4 = pnand %p992_p3, %p989_p2 }
  0x28   :  { %997 = shalt.err (!%p994_p4)
}
  0x29   :  { %s998_s25 = scalar_lea.vmem %s55_s15, 2048  ;;  %p1003_p6 = scmp.lt.s32.totalorder %s55_s15, %s55_s15 }
  0x2a   :  { %p999_p5 = scmp.ne.s32.totalorder %s55_s15, %s998_s25  ;;  %p1004_p7 = scmp.lt.s32.totalorder %s998_s25, %s998_s25 }
  0x2c   :  { %p1005_p8 = por %p1004_p7, %p1003_p6 }
  0x2e   :  { %p1006_p9 = pnand %p1005_p8, %p999_p5 }
  0x30   :  { %1009 = shalt.err (!%p1006_p9)
}
  0x31   :  { %s1019_s2 = smov 128   ;;  %s1020_s12 = smov 8  }
  0x32   :  { %60 = dma.hbm_to_vmem [thread:$0]  %s1181_s6, 2048, %s55_s15, [#allocation7], %s1019_s2, %s1019_s2, %s1020_s12  }
  0x33   :  { %1010 = dma.done.wait [#allocation5], 6144  }
  0x34   :  { %1011 = vsyncadd [#allocation5], 4294961152 }
  0x35   :  { %1012 = dma.done.wait [#allocation7], 8192  }
  0x36   :  { %1013 = vsyncadd [#allocation7], 4294959104  ;;  %v1021_v0 = vmov 0.0|0.0   ;;  %v1022_v1 = vmov 0.0   ;;  %vm1023_vm0 = vmmov 0   ;;  %v74_v2 = vld [vmem:[#allocation4 + $0x8] sm:$0xff] }
  0x37   :  { %814 = vmatprep.subr.bf16.mxu1 %v1021_v0  ;;  %202 = vmatprep.mubr.f32.mxu0 %v1022_v1  ;;  %v77_v3 = vld [vmem:[#allocation4 + $0x20] sm:$0xff]  ;;  %v76_v6 = vld [vmem:[#allocation4 + $0x18] sm:$0xff]  ;;  %v83_v8 = vld [vmem:[#allocation4 + $0x50] sm:$0xff] }
  0x38   :  { %709 = vmatprep.mubr.msk.f32.mxu1 %vm1023_vm0, %v1022_v1  ;;  %v73_v4 = vld [vmem:[#allocation4] sm:$0xff]  ;;  %v782_v5 = vpack.c.bf16 %v77_v3, %v74_v2  ;;  %v80_v7 = vld [vmem:[#allocation4 + $0x38] sm:$0xff]  ;;  %v79_v11 = vld [vmem:[#allocation4 + $0x30] sm:$0xff] }
  0x39   :  { %v784_v9 = vpack.c.bf16 %v76_v6, %v73_v4  ;;  %v786_v10 = vpack.c.bf16 %v83_v8, %v80_v7  ;;  %v82_v12 = vld [vmem:[#allocation4 + $0x48] sm:$0xff]  ;;  %v89_v14 = vld [vmem:[#allocation4 + $0x80] sm:$0xff]  ;;  %v88_v18 = vld [vmem:[#allocation4 + $0x78] sm:$0xff] }
  0x3a   :  { %v86_v13 = vld [vmem:[#allocation4 + $0x68] sm:$0xff]  ;;  %783 = vmatprep.subr.bf16.mxu0 %v782_v5  ;;  %v788_v15 = vpack.c.bf16 %v82_v12, %v79_v11  ;;  %v85_v17 = vld [vmem:[#allocation4 + $0x60] sm:$0xff]  ;;  %v92_v19 = vld [vmem:[#allocation4 + $0x98] sm:$0xff] }
  0x3b   :  { %785 = vmatpush1.bf16.msra.mxu0 %v784_v9  ;;  %v790_v16 = vpack.c.bf16 %v89_v14, %v86_v13  ;;  %v95_v20 = vld [vmem:[#allocation4 + $0xb0] sm:$0xff]  ;;  %v792_v21 = vpack.c.bf16 %v88_v18, %v85_v17  ;;  %v94_v24 = vld [vmem:[#allocation4 + $0xa8] sm:$0xff]  ;;  %v101_v28 = vld [vmem:[#allocation4 + $0xe0] sm:$0xff] }
  0x3c   :  { %787 = vmatprep.subr.bf16.mxu0 %v786_v10  ;;  %v91_v22 = vld [vmem:[#allocation4 + $0x90] sm:$0xff]  ;;  %v794_v23 = vpack.c.bf16 %v95_v20, %v92_v19  ;;  %v78_v26 = vld [vmem:[#allocation4 + $0x28] sm:$0xff]  ;;  %v81_v30 = vld [vmem:[#allocation4 + $0x40] sm:$0xff] }
  0x3d   :  { %v75_v25 = vld [vmem:[#allocation4 + $0x10] sm:$0xff]  ;;  %v98_v27 = vld [vmem:[#allocation4 + $0xc8] sm:$0xff]  ;;  %v84_v31 = vld [vmem:[#allocation4 + $0x58] sm:$0xff]  ;;  %v796_v32 = vpack.c.bf16 %v94_v24, %v91_v22 }
  0x3e   :  { %v815_v29 = vpack.c.bf16 %v78_v26, %v75_v25  ;;  %v818_v33 = vpack.c.bf16 %v84_v31, %v81_v30  ;;  %v798_v34 = vpack.c.bf16 %v101_v28, %v98_v27  ;;  %v97_v35 = vld [vmem:[#allocation4 + $0xc0] sm:$0xff]  ;;  %v100_v36 = vld [vmem:[#allocation4 + $0xd8] sm:$0xff]  ;;  %v87_v37 = vld [vmem:[#allocation4 + $0x70] sm:$0xff] }
  0x3f   :  { %789 = vmatpush1.bf16.msra.mxu0 %v788_v15  ;;  %v104_v38 = vld [vmem:[#allocation4 + $0xf8] sm:$0xff]  ;;  %v107_v39 = vld [vmem:[#allocation4 + $0x110] sm:$0xff]  ;;  %v90_v40 = vld [vmem:[#allocation4 + $0x88] sm:$0xff]  ;;  %v800_v41 = vpack.c.bf16 %v100_v36, %v97_v35 }
  0x40   :  { %791 = vmatprep.subr.bf16.mxu0 %v790_v16  ;;  %816 = vmatpush3.bf16.msra.mxu1 %v815_v29  ;;  %v103_v42 = vld [vmem:[#allocation4 + $0xf0] sm:$0xff]  ;;  %v821_v43 = vpack.c.bf16 %v90_v40, %v87_v37  ;;  %v802_v44 = vpack.c.bf16 %v107_v39, %v104_v38  ;;  %v106_v45 = vld [vmem:[#allocation4 + $0x108] sm:$0xff]  ;;  %v93_v46 = vld [vmem:[#allocation4 + $0xa0] sm:$0xff] }
  0x41   :  { %817 = vmatprep.subr.bf16.mxu1 %v1021_v0  ;;  %v96_v47 = vld [vmem:[#allocation4 + $0xb8] sm:$0xff]  ;;  %v110_v48 = vld [vmem:[#allocation4 + $0x128] sm:$0xff]  ;;  %v113_v49 = vld [vmem:[#allocation4 + $0x140] sm:$0xff]  ;;  %v804_v50 = vpack.c.bf16 %v106_v45, %v103_v42 }
  0x42   :  { %v109_v51 = vld [vmem:[#allocation4 + $0x120] sm:$0xff]  ;;  %v824_v52 = vpack.c.bf16 %v96_v47, %v93_v46  ;;  %v806_v53 = vpack.c.bf16 %v113_v49, %v110_v48  ;;  %v112_v54 = vld [vmem:[#allocation4 + $0x138] sm:$0xff]  ;;  %v99_v55 = vld [vmem:[#allocation4 + $0xd0] sm:$0xff] }
  0x43   :  { %793 = vmatpush1.bf16.msra.mxu0 %v792_v21  ;;  %v102_v56 = vld [vmem:[#allocation4 + $0xe8] sm:$0xff]  ;;  %v116_v57 = vld [vmem:[#allocation4 + $0x158] sm:$0xff]  ;;  %v119_v58 = vld [vmem:[#allocation4 + $0x170] sm:$0xff]  ;;  %v808_v59 = vpack.c.bf16 %v112_v54, %v109_v51 }
  0x44   :  { %795 = vmatprep.subr.bf16.mxu0 %v794_v23  ;;  %819 = vmatpush3.bf16.msra.mxu1 %v818_v33  ;;  %v115_v60 = vld [vmem:[#allocation4 + $0x150] sm:$0xff]  ;;  %v827_v61 = vpack.c.bf16 %v102_v56, %v99_v55  ;;  %v810_v62 = vpack.c.bf16 %v119_v58, %v116_v57  ;;  %v118_v63 = vld [vmem:[#allocation4 + $0x168] sm:$0xff]  ;;  %v105_v2 = vld [vmem:[#allocation4 + $0x100] sm:$0xff] }
  0x45   :  { %820 = vmatprep.subr.bf16.mxu1 %v1021_v0  ;;  %v108_v3 = vld [vmem:[#allocation4 + $0x118] sm:$0xff]  ;;  %v307_v4 = vld [vmem:[#allocation6 + $0x8] sm:$0xff]  ;;  %v310_v5 = vld [vmem:[#allocation6 + $0x20] sm:$0xff]  ;;  %v812_v6 = vpack.c.bf16 %v118_v63, %v115_v60 }
  0x46   :  { %v306_v7 = vld [vmem:[#allocation6] sm:$0xff]  ;;  %v830_v8 = vpack.c.bf16 %v108_v3, %v105_v2  ;;  %v838_v9 = vpack.c.bf16 %v310_v5, %v307_v4  ;;  %v309_v10 = vld [vmem:[#allocation6 + $0x18] sm:$0xff]  ;;  %v111_v11 = vld [vmem:[#allocation4 + $0x130] sm:$0xff] }
  0x47   :  { %797 = vmatpush1.bf16.msra.mxu0 %v796_v32  ;;  %v114_v12 = vld [vmem:[#allocation4 + $0x148] sm:$0xff]  ;;  %v313_v13 = vld [vmem:[#allocation6 + $0x38] sm:$0xff]  ;;  %v316_v14 = vld [vmem:[#allocation6 + $0x50] sm:$0xff]  ;;  %v840_v16 = vpack.c.bf16 %v309_v10, %v306_v7 }
  0x48   :  { %799 = vmatprep.subr.bf16.mxu0 %v798_v34  ;;  %822 = vmatpush3.bf16.msra.mxu1 %v821_v43  ;;  %v72_v15 = vld [vmem:[%s1175_s0] sm:$0xff]  ;;  %v312_v17 = vld [vmem:[#allocation6 + $0x30] sm:$0xff]  ;;  %v833_v18 = vpack.c.bf16 %v114_v12, %v111_v11  ;;  %v842_v19 = vpack.c.bf16 %v316_v14, %v313_v13  ;;  %v315_v20 = vld [vmem:[#allocation6 + $0x48] sm:$0xff] }
  0x49   :  { %823 = vmatprep.subr.bf16.mxu1 %v1021_v0  ;;  %v117_v21 = vld [vmem:[#allocation4 + $0x160] sm:$0xff]  ;;  %v120_v22 = vld [vmem:[#allocation4 + $0x178] sm:$0xff]  ;;  %v319_v23 = vld [vmem:[#allocation6 + $0x68] sm:$0xff]  ;;  %v844_v25 = vpack.c.bf16 %v315_v20, %v312_v17 }
  0x4a   :  { %v322_v24 = vld [vmem:[#allocation6 + $0x80] sm:$0xff]  ;;  %v836_v27 = vpack.c.bf16 %v120_v22, %v117_v21  ;;  %v321_v29 = vld [vmem:[#allocation6 + $0x78] sm:$0xff]  ;;  %v308_v30 = vld [vmem:[#allocation6 + $0x10] sm:$0xff] }
  0x4b   :  { %801 = vmatpush1.bf16.msra.mxu0 %v800_v41  ;;  %v318_v26 = vld [vmem:[#allocation6 + $0x60] sm:$0xff]  ;;  %v846_v28 = vpack.c.bf16 %v322_v24, %v319_v23  ;;  %v311_v31 = vld [vmem:[#allocation6 + $0x28] sm:$0xff]  ;;  %v325_v32 = vld [vmem:[#allocation6 + $0x98] sm:$0xff] }
  0x4c   :  { %803 = vmatprep.subr.bf16.mxu0 %v802_v44  ;;  %825 = vmatpush3.bf16.msra.mxu1 %v824_v52  ;;  %v328_v33 = vld [vmem:[#allocation6 + $0xb0] sm:$0xff]  ;;  %v848_v34 = vpack.c.bf16 %v321_v29, %v318_v26  ;;  %v871_v36 = vpack.c.bf16 %v311_v31, %v308_v30  ;;  %v327_v38 = vld [vmem:[#allocation6 + $0xa8] sm:$0xff]  ;;  %v314_v39 = vld [vmem:[#allocation6 + $0x40] sm:$0xff] }
  0x4d   :  { %826 = vmatprep.subr.bf16.mxu1 %v1021_v0  ;;  %v324_v35 = vld [vmem:[#allocation6 + $0x90] sm:$0xff]  ;;  %v850_v37 = vpack.c.bf16 %v328_v33, %v325_v32  ;;  %v317_v40 = vld [vmem:[#allocation6 + $0x58] sm:$0xff]  ;;  %v331_v41 = vld [vmem:[#allocation6 + $0xc8] sm:$0xff] }
  0x4e   :  { %v334_v42 = vld [vmem:[#allocation6 + $0xe0] sm:$0xff]  ;;  %v852_v43 = vpack.c.bf16 %v327_v38, %v324_v35  ;;  %v874_v45 = vpack.c.bf16 %v317_v40, %v314_v39  ;;  %v333_v47 = vld [vmem:[#allocation6 + $0xd8] sm:$0xff]  ;;  %v320_v48 = vld [vmem:[#allocation6 + $0x70] sm:$0xff] }
  0x4f   :  { %805 = vmatpush1.bf16.msra.mxu0 %v804_v50  ;;  %v330_v44 = vld [vmem:[#allocation6 + $0xc0] sm:$0xff]  ;;  %v854_v46 = vpack.c.bf16 %v334_v42, %v331_v41  ;;  %v323_v49 = vld [vmem:[#allocation6 + $0x88] sm:$0xff]  ;;  %v337_v50 = vld [vmem:[#allocation6 + $0xf8] sm:$0xff] }
  0x50   :  { %807 = vmatprep.subr.bf16.mxu0 %v806_v53  ;;  %828 = vmatpush3.bf16.msra.mxu1 %v827_v61  ;;  %v340_v51 = vld [vmem:[#allocation6 + $0x110] sm:$0xff]  ;;  %v856_v52 = vpack.c.bf16 %v333_v47, %v330_v44  ;;  %v877_v54 = vpack.c.bf16 %v323_v49, %v320_v48  ;;  %v339_v56 = vld [vmem:[#allocation6 + $0x108] sm:$0xff]  ;;  %v326_v57 = vld [vmem:[#allocation6 + $0xa0] sm:$0xff]  ;;  %v123_v49 = vlaneseq }
  0x51   :  { %829 = vmatprep.subr.bf16.mxu1 %v1021_v0  ;;  %v336_v53 = vld [vmem:[#allocation6 + $0xf0] sm:$0xff]  ;;  %v858_v55 = vpack.c.bf16 %v340_v51, %v337_v50  ;;  %v329_v58 = vld [vmem:[#allocation6 + $0xb8] sm:$0xff]  ;;  %v346_v60 = vld [vmem:[#allocation6 + $0x140] sm:$0xff] }
  0x52   :  { %v860_v61 = vpack.c.bf16 %v339_v56, %v336_v53  ;;  %v880_v63 = vpack.c.bf16 %v329_v58, %v326_v57  ;;  %v345_v3 = vld [vmem:[#allocation6 + $0x138] sm:$0xff]  ;;  %v332_v4 = vld [vmem:[#allocation6 + $0xd0] sm:$0xff]  ;;  %v335_v5 = vld [vmem:[#allocation6 + $0xe8] sm:$0xff]  ;;  %v124_v50 = vshrl.u32 %v123_v49, 7 }
  0x53   :  { %809 = vmatpush1.bf16.msra.mxu0 %v808_v59  ;;  %v343_v59 = vld [vmem:[#allocation6 + $0x128] sm:$0xff]  ;;  %v352_v7 = vld [vmem:[#allocation6 + $0x170] sm:$0xff]  ;;  %v883_v10 = vpack.c.bf16 %v335_v5, %v332_v4  ;;  %v338_v13 = vld [vmem:[#allocation6 + $0x100] sm:$0xff] }
  0x54   :  { %811 = vmatprep.subr.bf16.mxu0 %v810_v62  ;;  %831 = vmatpush3.bf16.msra.mxu1 %v830_v8  ;;  %v342_v62 = vld [vmem:[#allocation6 + $0x120] sm:$0xff]  ;;  %v862_v2 = vpack.c.bf16 %v346_v60, %v343_v59  ;;  %v351_v12 = vld [vmem:[#allocation6 + $0x168] sm:$0xff]  ;;  %v341_v14 = vld [vmem:[#allocation6 + $0x118] sm:$0xff]  ;;  %v125_v51 = vsub.s32 0, %v124_v50 }
  0x55   :  { %832 = vmatprep.subr.bf16.mxu1 %v1021_v0  ;;  %v864_v8 = vpack.c.bf16 %v345_v3, %v342_v62  ;;  %v344_v17 = vld [vmem:[#allocation6 + $0x130] sm:$0xff]  ;;  %v350_v21 = vld [vmem:[#allocation6 + $0x160] sm:$0xff]  ;;  %v353_v22 = vld [vmem:[#allocation6 + $0x178] sm:$0xff] }
  0x56   :  { %v892_v23 = vpack.c.bf16 %v353_v22, %v350_v21  ;;  %v519_v24 = vld [vmem:[#allocation8] sm:$0xff]  ;;  %v524_v31 = vld [vmem:[#allocation8 + $0x28] sm:$0xff]  ;;  %v525_v32 = vld [vmem:[#allocation8 + $0x30] sm:$0xff] }
  0x57   :  { %813 = vmatpush1.bf16.msra.mxu0 %v812_v6  ;;  %v349_v6 = vld [vmem:[#allocation6 + $0x158] sm:$0xff]  ;;  %v523_v30 = vld [vmem:[#allocation8 + $0x20] sm:$0xff]  ;;  %v529_v38 = vld [vmem:[#allocation8 + $0x50] sm:$0xff] }
  0x58   :  { %839 = vmatprep.subr.bf16.mxu0 %v838_v9  ;;  %834 = vmatpush3.bf16.msra.mxu1 %v833_v18  ;;  %v348_v9 = vld [vmem:[#allocation6 + $0x150] sm:$0xff]  ;;  %v866_v11 = vpack.c.bf16 %v352_v7, %v349_v6  ;;  %v347_v18 = vld [vmem:[#allocation6 + $0x148] sm:$0xff]  ;;  %v526_v33 = vld [vmem:[#allocation8 + $0x38] sm:$0xff] }
  0x59   :  { %835 = vmatprep.subr.bf16.mxu1 %v1021_v0  ;;  %v889_v20 = vpack.c.bf16 %v347_v18, %v344_v17  ;;  %v527_v35 = vld [vmem:[#allocation8 + $0x40] sm:$0xff]  ;;  %v530_v39 = vld [vmem:[#allocation8 + $0x58] sm:$0xff]  ;;  %v532_v42 = vld [vmem:[#allocation8 + $0x68] sm:$0xff] }
  0x5a   :  { %203 = vmatmul.mubr.f32.vlgmr.msra.gmra.mrb[0].mxu0 %v72_v15  ;;  %v910_v40 = vpack.c.bf16 %v530_v39, %v529_v38  ;;  %v531_v41 = vld [vmem:[#allocation8 + $0x60] sm:$0xff]  ;;  %v533_v44 = vld [vmem:[#allocation8 + $0x70] sm:$0xff] }
  0x5b   :  { %841 = vmatpush1.bf16.msra.mxu0 %v840_v16  ;;  %418 = vmatprep.mubr.f32.mxu0 %v1022_v1  ;;  %v886_v16 = vpack.c.bf16 %v341_v14, %v338_v13  ;;  %v121_v53 = vld [vmem:[%s1178_s3] sm:$0x7] }
  0x5c   :  { %843 = vmatprep.subr.bf16.mxu0 %v842_v19  ;;  %837 = vmatpush3.bf16.msra.mxu1 %v836_v27  ;;  %v1143_v19 = vld [vmem:[%s1176_s1] sm:$0xff]  ;;  %v521_v27 = vld [vmem:[#allocation8 + $0x10] sm:$0xff] }
  0x5d   :  { %870 = vmatprep.subr.bf16.mxu1 %v1021_v0 }
  0x5f   :  { %845 = vmatpush1.bf16.msra.mxu0 %v844_v25  ;;  %710 = vmatmul.mubr.f32.vlgmr.msra.gmra.mrb[0].mxu1 %v72_v15  ;;  %v868_v15 = vpack.c.bf16 %v351_v12, %v348_v9  ;;  %v520_v25 = vld [vmem:[#allocation8 + $0x8] sm:$0xff] }
  0x60   :  { %847 = vmatprep.subr.bf16.mxu0 %v846_v28  ;;  %872 = vmatpush3.bf16.msra.mxu1 %v871_v36  ;;  %v895_v26 = vpack.c.bf16 %v520_v25, %v519_v24  ;;  %v522_v28 = vld [vmem:[#allocation8 + $0x18] sm:$0xff]  ;;  %v528_v36 = vld [vmem:[#allocation8 + $0x48] sm:$0xff]  ;;  %v625_v25 = vld [vmem:[%s1182_s7] ss:$0 sm:$0xff] }
  0x61   :  { %873 = vmatprep.subr.bf16.mxu1 %v1021_v0  ;;  %744 = vmatprep.mubr.msk.f32.mxu1 %vm1023_vm0, %v1022_v1  ;;  %v898_v29 = vpack.c.bf16 %v522_v28, %v521_v27 }
  0x63   :  { %849 = vmatpush1.bf16.msra.mxu0 %v848_v34  ;;  %v904_v34 = vpack.c.bf16 %v526_v33, %v525_v32 }
  0x64   :  { %851 = vmatprep.subr.bf16.mxu0 %v850_v37  ;;  %875 = vmatpush3.bf16.msra.mxu1 %v874_v45  ;;  %v907_v37 = vpack.c.bf16 %v528_v36, %v527_v35  ;;  %v534_v45 = vld [vmem:[#allocation8 + $0x78] sm:$0xff] }
  0x65   :  { %876 = vmatprep.subr.bf16.mxu1 %v1021_v0 }
  0x67   :  { %853 = vmatpush1.bf16.msra.mxu0 %v852_v43  ;;  %v913_v43 = vpack.c.bf16 %v532_v42, %v531_v41 }
  0x68   :  { %855 = vmatprep.subr.bf16.mxu0 %v854_v46  ;;  %878 = vmatpush3.bf16.msra.mxu1 %v877_v54  ;;  %v916_v46 = vpack.c.bf16 %v534_v45, %v533_v44  ;;  %v129_v54 = vsub.s32 1, %v124_v50 }
  0x69   :  { %879 = vmatprep.subr.bf16.mxu1 %v1021_v0 }
  0x6a   :  { %v130_v57 = vrot.slane %v121_v53, %v129_v54 }
  0x6b   :  { %857 = vmatpush1.bf16.msra.mxu0 %v856_v52  ;;  %v282_v52 = vld [vmem:[%s1180_s5] sm:$0x7] }
  0x6c   :  { %859 = vmatprep.subr.bf16.mxu0 %v858_v55  ;;  %881 = vmatpush3.bf16.msra.mxu1 %v880_v63  ;;  %v126_v55 = vrot.slane %v121_v53, %v125_v51  ;;  %v287_v56 = vrot.slane %v282_v52, %v125_v51  ;;  %v291_v58 = vrot.slane %v282_v52, %v129_v54 }
  0x6d   :  { %882 = vmatprep.subr.bf16.mxu1 %v1021_v0 }
  0x6e   :  { %v920_v60 = vadd.f32 %v291_v58, %v130_v57 }
  0x6f   :  { %861 = vmatpush1.bf16.msra.mxu0 %v860_v61 }
  0x70   :  { %863 = vmatprep.subr.bf16.mxu0 %v862_v2  ;;  %884 = vmatpush3.bf16.msra.mxu1 %v883_v10 }
  0x71   :  { %885 = vmatprep.subr.bf16.mxu1 %v1021_v0 }
  0x73   :  { %865 = vmatpush1.bf16.msra.mxu0 %v864_v8  ;;  %v133_v8 = vsub.s32 2, %v124_v50 }
  0x74   :  { %867 = vmatprep.subr.bf16.mxu0 %v866_v11  ;;  %887 = vmatpush3.bf16.msra.mxu1 %v886_v16 }
  0x75   :  { %888 = vmatprep.subr.bf16.mxu1 %v1021_v0  ;;  %v295_v9 = vrot.slane %v282_v52, %v133_v8  ;;  %v134_v11 = vrot.slane %v121_v53, %v133_v8 }
  0x77   :  { %869 = vmatpush1.bf16.msra.mxu0 %v868_v15 }
  0x78   :  { %894 = vmatprep.subr.bf16.mxu0 %v1021_v0  ;;  %890 = vmatpush3.bf16.msra.mxu1 %v889_v20 }
  0x79   :  { %891 = vmatprep.subr.bf16.mxu1 %v1021_v0 }
  0x7a   :  { %419 = vmatmul.mubr.f32.vlgmr.msra.gmra.mrb[0].mxu0 %v1143_v19 }
  0x7b   :  { %779 = vmatprep.mubr.msk.f32.mxu0 %vm1023_vm0, %v1022_v1  ;;  %896 = vmatpush3.bf16.msra.mxu0 %v895_v26  ;;  %v901_v1 = vpack.c.bf16 %v524_v31, %v523_v30 }
  0x7c   :  { %893 = vmatpush3.bf16.msra.mxu1 %v892_v23  ;;  %897 = vmatprep.subr.bf16.mxu0 %v1021_v0 }
  0x7f   :  { %745 = vmatmul.mubr.f32.vlgmr.msra.gmra.mrb[2].mxu1 %v1143_v19  ;;  %899 = vmatpush3.bf16.msra.mxu0 %v898_v29 }
  0x80   :  { %900 = vmatprep.subr.bf16.mxu0 %v1021_v0 }
  0x83   :  { %902 = vmatpush3.bf16.msra.mxu0 %v901_v1 }
  0x84   :  { %903 = vmatprep.subr.bf16.mxu0 %v1021_v0 }
  0x87   :  { %905 = vmatpush3.bf16.msra.mxu0 %v904_v34 }
  0x88   :  { %906 = vmatprep.subr.bf16.mxu0 %v1021_v0 }
  0x8b   :  { %908 = vmatpush3.bf16.msra.mxu0 %v907_v37 }
  0x8c   :  { %909 = vmatprep.subr.bf16.mxu0 %v1021_v0 }
  0x8f   :  { %911 = vmatpush3.bf16.msra.mxu0 %v910_v40 }
  0x90   :  { %912 = vmatprep.subr.bf16.mxu0 %v1021_v0 }
  0x93   :  { %914 = vmatpush3.bf16.msra.mxu0 %v913_v43 }
  0x94   :  { %915 = vmatprep.subr.bf16.mxu0 %v1021_v0  ;;  %v918_v0 = vadd.f32 %v287_v56, %v126_v55 }
  0x97   :  { %917 = vmatpush3.bf16.msra.mxu0 %v916_v46 }
 0x132   :  { %v275_v47 = vpop.f32.mrb[0].mxu1 }
 0x133   :  { %v711_v48 = vpop.f32.mrb[1].mxu1  ;;  %v276_v15 = vadd.f32 %v275_v47, %v134_v11 }
 0x14d   :  { %v420_v59 = vpop.f32.mrb[0].mxu0 }
 0x14e   :  { %v919_v61 = vadd.f32 %v918_v0, %v420_v59  ;;  %v422_v62 = vpop.f32.mrb[1].mxu0 }
 0x14f   :  { %v921_v2 = vadd.f32 %v920_v60, %v422_v62 }
 0x150   :  { %v623_v63 = vmul.f32 -1.442695, %v919_v61 }
 0x151   :  { %v624_v3 = vmul.f32 -1.442695, %v921_v2 }
 0x152   :  { %934 = vpow2.f32 %v623_v63  ;;  %v491_v4 = vpop.f32.mrb[2].mxu1 }
 0x153   :  { %v746_v5 = vpop.f32.mrb[3].mxu1  ;;  %936 = vpow2.f32 %v624_v3  ;;  %v492_v13 = vadd.f32 %v491_v4, %v295_v9 }
 0x15c   :  { %v935_v6 = vpop.eup %934 }
 0x15d   :  { %v503_v7 = vadd.f32 1.0, %v935_v6  ;;  %v937_v10 = vpop.eup %936 }
 0x15e   :  { %v504_v12 = vadd.f32 1.0, %v937_v10 }
 0x15f   :  { %938 = vrcp.f32 %v503_v7 }
 0x160   :  { %940 = vrcp.f32 %v504_v12 }
 0x169   :  { %v939_v14 = vpop.eup %938 }
 0x16a   :  { %v509_v16 = vmul.f32 %v939_v14, %v492_v13  ;;  %v941_v18 = vpop.eup %940 }
 0x16b   :  { %v512_v20 = vsub.f32 1.0, %v941_v18  ;;  %v514_v23 = vmul.f32 %v941_v18, %v1143_v19 }
 0x16c   :  { %v510_v17 = vadd.f32 %v509_v16, %v276_v15 }
 0x16e   :  { %942 = vtanh.f32 %v510_v17 }
 0x178   :  { %v943_v21 = vpop.eup %942 }
 0x179   :  { %v513_v22 = vmul.f32 %v943_v21, %v512_v20 }
 0x17b   :  { %v515_v24 = vadd.f32 %v514_v23, %v513_v22 }
 0x17d   :  { %517 = vst [vmem:[%s1184_s9] sm:$0xff] %v515_v24  ;;  %780 = vmatmul.mubr.f32.vlgmr.msra.gmra.mrb[2].mxu0 %v515_v24 }
 0x250   :  { %v608_v26 = vpop.f32.mrb[2].mxu0 }
 0x251   :  { %v609_v27 = vadd.f32 %v625_v25, %v608_v26  ;;  %v781_v28 = vpop.f32.mrb[3].mxu0 }
 0x253   :  { %612 = vst [vmem:[%s1183_s8] sm:$0xff] %v609_v27 }
 0x254   :  { %621 = vsyncpa [#allocation5], 1 }
 0x255   :  { %622 = vsyncpa [#allocation7], 1 }

</bundles_post_ra>
